<compile_context>
chip_gen: v7x
topology: tpu7x:2x2x1
jax: 0.10.0
libtpu: 0.0.40
codegen_flags: <defaults>
</compile_context>

<pallas_src>
import jax
import jax.numpy as jnp
from jax.experimental import pallas as pl
from jax.experimental.pallas import tpu as pltpu

LANES = 128


def _cdiv(a, b):
    return -(-a // b)


def policy_kernel(w_ref, b_ref, x_ref, o_ref):
    # w_ref: SMEM (8,)  = torch weight (2, 4) flattened row-major
    # b_ref: SMEM (2,)
    # x_ref: VMEM (4, R_TILE, 128)  features leading, batch on (sublane, lane)
    # o_ref: VMEM (2, R_TILE, 128)  softmax probs, same batch layout
    x0 = x_ref[0]
    x1 = x_ref[1]
    x2 = x_ref[2]
    x3 = x_ref[3]

    # Linear: logit_j = sum_k w[j, k] * x[k] + b[j]   (nn.Linear semantics)
    l0 = w_ref[0] * x0 + w_ref[1] * x1 + w_ref[2] * x2 + w_ref[3] * x3 + b_ref[0]
    l1 = w_ref[4] * x0 + w_ref[5] * x1 + w_ref[6] * x2 + w_ref[7] * x3 + b_ref[1]

    # Stable 2-way softmax in sigmoid form: one exp, one exact reciprocal.
    #   p_max = 1 / (1 + exp(-|l0 - l1|)),  p_min = exp(-|l0 - l1|) * p_max
    d = -jnp.abs(l0 - l1)
    e = jnp.exp(d)
    inv = 1.0 / (1.0 + e)          # exact: row sums == 1 to f32 precision
    p_max = inv
    p_min = e * inv
    hi0 = l0 >= l1
    o_ref[0] = jnp.where(hi0, p_max, p_min).astype(o_ref.dtype)
    o_ref[1] = jnp.where(hi0, p_min, p_max).astype(o_ref.dtype)


def policy_nn_forward(x, weight, bias, *, tile_rows_max=1024):
    """x: (B, 4) float32, weight: (2, 4), bias: (2,). Returns (B, 2) softmax probs.

    tile_rows_max: max sublane-rows (of 128 batch elements each) per grid step.
    1024 rows -> 128K elements/step, ~6 MiB double-buffered VMEM (safe on
    v5e/v6e/v7x scoped defaults).
    """
    B = x.shape[0]

    # Batch laid out as (rows, 128 lanes); tiles balanced to limit pad waste.
    r_total = _cdiv(B, LANES)
    num_tiles = _cdiv(r_total, tile_rows_max)
    if num_tiles <= 1:
        num_tiles = 1
        r_tile = r_total                      # full-extent block: no /8 constraint
    else:
        r_tile = _cdiv(_cdiv(r_total, num_tiles), 8) * 8   # multiple of 8 sublanes
        num_tiles = _cdiv(r_total, r_tile)
    r_pad = num_tiles * r_tile
    b_pad = r_pad * LANES

    # Lane+sublane-dense input: features on leading axis, batch on (rows, lanes).
    x_pad = jnp.pad(x.astype(jnp.float32), ((0, b_pad - B), (0, 0)))
    x3d = x_pad.T.reshape(4, r_pad, LANES)
    w_flat = weight.astype(jnp.float32).reshape(-1)   # (8,)
    b_vec = bias.astype(jnp.float32).reshape(-1)      # (2,)

    out3d = pl.pallas_call(
        policy_kernel,
        out_shape=jax.ShapeDtypeStruct((2, r_pad, LANES), jnp.float32),
        grid_spec=pltpu.PrefetchScalarGridSpec(
            num_scalar_prefetch=0,
            grid=(num_tiles,),
            in_specs=[
                pl.BlockSpec(memory_space=pltpu.MemorySpace.SMEM),   # weight (8,)
                pl.BlockSpec(memory_space=pltpu.MemorySpace.SMEM),   # bias (2,)
                pl.BlockSpec((4, r_tile, LANES), lambda i: (0, i, 0)),
            ],
            out_specs=pl.BlockSpec((2, r_tile, LANES), lambda i: (0, i, 0)),
        ),
        compiler_params=pltpu.CompilerParams(
            dimension_semantics=("parallel",),
        ),
        cost_estimate=pl.CostEstimate(
            flops=int(20 * b_pad),
            transcendentals=int(2 * b_pad),
            bytes_accessed=int(24 * b_pad + 40),
        ),
    )(w_flat, b_vec, x3d)

    # Back to (B, 2), dropping padded batch rows.
    return out3d.reshape(2, b_pad).T[:B]


def _reference(x, weight, bias):
    return jax.nn.softmax(x @ weight.T + bias, axis=1)


if __name__ == "__main__":
    key = jax.random.PRNGKey(0)
    kx, kw, kb, kx2 = jax.random.split(key, 4)

    # Deterministic parameter init mimicking nn.Linear(4, 2):
    # uniform(-1/sqrt(4), 1/sqrt(4)) for weight and bias.
    bound = 1.0 / (4 ** 0.5)
    weight = jax.random.uniform(kw, (2, 4), minval=-bound, maxval=bound, dtype=jnp.float32)
    bias = jax.random.uniform(kb, (2,), minval=-bound, maxval=bound, dtype=jnp.float32)

    fwd = jax.jit(policy_nn_forward, static_argnames=("tile_rows_max",))

    # Small batch (single tile, full-extent block).
    B = 8
    x = jax.random.normal(kx, (B, 4), dtype=jnp.float32)
    out = jax.block_until_ready(fwd(x, weight, bias))
    ref = _reference(x, weight, bias)
    assert out.shape == (B, 2)
    assert jnp.allclose(out, ref, atol=1e-4, rtol=1e-4)
    assert jnp.allclose(jnp.sum(out, axis=1), jnp.ones((B,)), atol=1e-4)

    # Larger, non-lane-aligned batch (exercises padding).
    B2 = 1537
    x2 = jax.random.normal(kx2, (B2, 4), dtype=jnp.float32)
    out2 = jax.block_until_ready(fwd(x2, weight, bias))
    ref2 = _reference(x2, weight, bias)
    assert out2.shape == (B2, 2)
    assert jnp.allclose(out2, ref2, atol=1e-4, rtol=1e-4)
    assert jnp.allclose(jnp.sum(out2, axis=1), jnp.ones((B2,)), atol=1e-4)

    # Same batch with a tiny tile cap to exercise the multi-tile grid path
    # (r_tile rounded to a multiple of 8, num_tiles > 1).
    out3 = jax.block_until_ready(fwd(x2, weight, bias, tile_rows_max=8))
    assert out3.shape == (B2, 2)
    assert jnp.allclose(out3, ref2, atol=1e-4, rtol=1e-4)
    assert jnp.allclose(jnp.sum(out3, axis=1), jnp.ones((B2,)), atol=1e-4)

    print("KERNEL_OK")
</pallas_src>

<mosaic_0001>
module attributes {stable_mosaic.version = 11 : i64} {
  func.func @policy_kernel(%arg0: i32, %arg1: memref<8xf32, #tpu.memory_space<smem>>, %arg2: memref<2xf32, #tpu.memory_space<smem>>, %arg3: memref<4x1x128xf32, #tpu.memory_space<vmem>>, %arg4: memref<2x1x128xf32, #tpu.memory_space<vmem>>) attributes {dimension_semantics = [#tpu.dimension_semantics<parallel>], iteration_bounds = array<i64: 1>, scalar_prefetch = 0 : i64, scratch_operands = 0 : i64, tpu.core_type = #tpu.core_type<tc>, window_params = [{transform_indices = @transform_0, window_bounds = array<i64: 8>}, {transform_indices = @transform_1, window_bounds = array<i64: 2>}, {transform_indices = @transform_2, window_bounds = array<i64: 4, 1, 128>}, {transform_indices = @transform_3, window_bounds = array<i64: 2, 1, 128>}]} {
    %c0 = arith.constant 0 : index
    %c0_0 = arith.constant 0 : index
    %c0_1 = arith.constant 0 : index
    %0 = vector.load %arg3[%c0, %c0_0, %c0_1] : memref<4x1x128xf32, #tpu.memory_space<vmem>>, vector<1x1x128xf32>
    %1 = vector.shape_cast %0 : vector<1x1x128xf32> to vector<1x128xf32>
    %c1 = arith.constant 1 : index
    %c0_2 = arith.constant 0 : index
    %c0_3 = arith.constant 0 : index
    %2 = vector.load %arg3[%c1, %c0_2, %c0_3] : memref<4x1x128xf32, #tpu.memory_space<vmem>>, vector<1x1x128xf32>
    %3 = vector.shape_cast %2 : vector<1x1x128xf32> to vector<1x128xf32>
    %c2 = arith.constant 2 : index
    %c0_4 = arith.constant 0 : index
    %c0_5 = arith.constant 0 : index
    %4 = vector.load %arg3[%c2, %c0_4, %c0_5] : memref<4x1x128xf32, #tpu.memory_space<vmem>>, vector<1x1x128xf32>
    %5 = vector.shape_cast %4 : vector<1x1x128xf32> to vector<1x128xf32>
    %c3 = arith.constant 3 : index
    %c0_6 = arith.constant 0 : index
    %c0_7 = arith.constant 0 : index
    %6 = vector.load %arg3[%c3, %c0_6, %c0_7] : memref<4x1x128xf32, #tpu.memory_space<vmem>>, vector<1x1x128xf32>
    %7 = vector.shape_cast %6 : vector<1x1x128xf32> to vector<1x128xf32>
    %c0_8 = arith.constant 0 : index
    %8 = memref.load %arg1[%c0_8] : memref<8xf32, #tpu.memory_space<smem>>
    %9 = vector.broadcast %8 : f32 to vector<1x128xf32>
    %10 = arith.mulf %9, %1 : vector<1x128xf32>
    %c1_9 = arith.constant 1 : index
    %11 = memref.load %arg1[%c1_9] : memref<8xf32, #tpu.memory_space<smem>>
    %12 = vector.broadcast %11 : f32 to vector<1x128xf32>
    %13 = arith.mulf %12, %3 : vector<1x128xf32>
    %14 = arith.addf %10, %13 : vector<1x128xf32>
    %c2_10 = arith.constant 2 : index
    %15 = memref.load %arg1[%c2_10] : memref<8xf32, #tpu.memory_space<smem>>
    %16 = vector.broadcast %15 : f32 to vector<1x128xf32>
    %17 = arith.mulf %16, %5 : vector<1x128xf32>
    %18 = arith.addf %14, %17 : vector<1x128xf32>
    %c3_11 = arith.constant 3 : index
    %19 = memref.load %arg1[%c3_11] : memref<8xf32, #tpu.memory_space<smem>>
    %20 = vector.broadcast %19 : f32 to vector<1x128xf32>
    %21 = arith.mulf %20, %7 : vector<1x128xf32>
    %22 = arith.addf %18, %21 : vector<1x128xf32>
    %c0_12 = arith.constant 0 : index
    %23 = memref.load %arg2[%c0_12] : memref<2xf32, #tpu.memory_space<smem>>
    %24 = vector.broadcast %23 : f32 to vector<1x128xf32>
    %25 = arith.addf %22, %24 : vector<1x128xf32>
    %c4 = arith.constant 4 : index
    %26 = memref.load %arg1[%c4] : memref<8xf32, #tpu.memory_space<smem>>
    %27 = vector.broadcast %26 : f32 to vector<1x128xf32>
    %28 = arith.mulf %27, %1 : vector<1x128xf32>
    %c5 = arith.constant 5 : index
    %29 = memref.load %arg1[%c5] : memref<8xf32, #tpu.memory_space<smem>>
    %30 = vector.broadcast %29 : f32 to vector<1x128xf32>
    %31 = arith.mulf %30, %3 : vector<1x128xf32>
    %32 = arith.addf %28, %31 : vector<1x128xf32>
    %c6 = arith.constant 6 : index
    %33 = memref.load %arg1[%c6] : memref<8xf32, #tpu.memory_space<smem>>
    %34 = vector.broadcast %33 : f32 to vector<1x128xf32>
    %35 = arith.mulf %34, %5 : vector<1x128xf32>
    %36 = arith.addf %32, %35 : vector<1x128xf32>
    %c7 = arith.constant 7 : index
    %37 = memref.load %arg1[%c7] : memref<8xf32, #tpu.memory_space<smem>>
    %38 = vector.broadcast %37 : f32 to vector<1x128xf32>
    %39 = arith.mulf %38, %7 : vector<1x128xf32>
    %40 = arith.addf %36, %39 : vector<1x128xf32>
    %c1_13 = arith.constant 1 : index
    %41 = memref.load %arg2[%c1_13] : memref<2xf32, #tpu.memory_space<smem>>
    %42 = vector.broadcast %41 : f32 to vector<1x128xf32>
    %43 = arith.addf %40, %42 : vector<1x128xf32>
    %44 = arith.subf %25, %43 : vector<1x128xf32>
    %45 = math.absf %44 : vector<1x128xf32>
    %cst = arith.constant 0.000000e+00 : f32
    %46 = vector.broadcast %cst : f32 to vector<1x128xf32>
    %47 = arith.subf %46, %45 : vector<1x128xf32>
    %48 = math.exp %47 : vector<1x128xf32>
    %cst_14 = arith.constant 1.000000e+00 : f32
    %49 = vector.broadcast %cst_14 : f32 to vector<1x128xf32>
    %50 = arith.addf %49, %48 : vector<1x128xf32>
    %cst_15 = arith.constant 1.000000e+00 : f32
    %51 = vector.broadcast %cst_15 : f32 to vector<1x128xf32>
    %52 = arith.divf %51, %50 : vector<1x128xf32>
    %53 = arith.mulf %48, %52 : vector<1x128xf32>
    %54 = arith.cmpf oge, %25, %43 : vector<1x128xf32>
    %55 = arith.select %54, %52, %53 : vector<1x128xi1>, vector<1x128xf32>
    %c0_16 = arith.constant 0 : index
    %c0_17 = arith.constant 0 : index
    %c0_18 = arith.constant 0 : index
    %56 = vector.load %arg4[%c0_16, %c0_17, %c0_18] : memref<2x1x128xf32, #tpu.memory_space<vmem>>, vector<1x1x128xf32>
    %57 = vector.shape_cast %56 : vector<1x1x128xf32> to vector<1x128xf32>
    %58 = vector.shape_cast %55 : vector<1x128xf32> to vector<1x1x128xf32>
    tpu.vector_store %arg4[%c0_16, %c0_17, %c0_18], %58 {strides = array<i32>} : memref<2x1x128xf32, #tpu.memory_space<vmem>>, vector<1x1x128xf32>,
    %59 = arith.select %54, %53, %52 : vector<1x128xi1>, vector<1x128xf32>
    %c1_19 = arith.constant 1 : index
    %c0_20 = arith.constant 0 : index
    %c0_21 = arith.constant 0 : index
    %60 = vector.load %arg4[%c1_19, %c0_20, %c0_21] : memref<2x1x128xf32, #tpu.memory_space<vmem>>, vector<1x1x128xf32>
    %61 = vector.shape_cast %60 : vector<1x1x128xf32> to vector<1x128xf32>
    %62 = vector.shape_cast %59 : vector<1x128xf32> to vector<1x1x128xf32>
    tpu.vector_store %arg4[%c1_19, %c0_20, %c0_21], %62 {strides = array<i32>} : memref<2x1x128xf32, #tpu.memory_space<vmem>>, vector<1x1x128xf32>,
    return
  }
  func.func @transform_0(%arg0: i32) -> i32 {
    %c0_i32 = arith.constant 0 : i32
    %c0_i32_0 = arith.constant 0 : i32
    return %c0_i32 : i32
  }
  func.func @transform_1(%arg0: i32) -> i32 {
    %c0_i32 = arith.constant 0 : i32
    %c0_i32_0 = arith.constant 0 : i32
    return %c0_i32 : i32
  }
  func.func @transform_2(%arg0: i32) -> (i32, i32, i32) {
    %c0_i32 = arith.constant 0 : i32
    %c0_i32_0 = arith.constant 0 : i32
    %c0_i32_1 = arith.constant 0 : i32
    return %c0_i32, %arg0, %c0_i32_0 : i32, i32, i32
  }
  func.func @transform_3(%arg0: i32) -> (i32, i32, i32) {
    %c0_i32 = arith.constant 0 : i32
    %c0_i32_0 = arith.constant 0 : i32
    %c0_i32_1 = arith.constant 0 : i32
    return %c0_i32, %arg0, %c0_i32_0 : i32, i32, i32
  }
}

</mosaic_0001>

<bundles_post_ra>
// kernel: policy_nn_forward.1
= control target key start
LH: loop header
LB: loop body
LE: loop exit
PB: predicated region body
PF: predicated region fallthrough
CT: control target
= control target key end

     0   :  { %8 = vsyncpa [#allocation4], 0  ;;  %s243_s0 = inlined_call_operand.vmem [shape: f32[8], index: 0, kind: input, shape index: {}]   ;;  %s244_s1 = inlined_call_operand.vmem [shape: f32[2], index: 1, kind: input, shape index: {}]   ;;  %s245_s2 = inlined_call_operand.vmem [shape: f32[4,1,128], index: 2, kind: input, shape index: {}]   ;;  %s246_s3 = inlined_call_operand.hbm [shape: f32[2,1,128], index: 3, kind: output, shape index: {}]  }
   0x1   :  { %9 = vsyncpa [#allocation6], 0 }
   0x2   :  { %10 = vsyncpa [#allocation3], 0  ;;  %s17_s14 = sshll.u32 %s243_s0, 4  ;;  %s27_s17 = sshll.u32 %s244_s1, 4  ;;  %s18_s14 = int_to_ptr.vmem [resolvable:$true] %s17_s14  ;;  %s28_s17 = int_to_ptr.vmem [resolvable:$true] %s27_s17 }
   0x3   :  { %s136_s18 = scalar_lea.vmem %s18_s14, 16  ;;  %p141_p1 = scmp.lt.s32.totalorder %s18_s14, %s18_s14 }
   0x4   :  { %p137_p0 = scmp.ne.s32.totalorder %s18_s14, %s136_s18  ;;  %p142_p2 = scmp.lt.s32.totalorder %s136_s18, %s136_s18 }
   0x6   :  { %p143_p3 = por %p142_p2, %p141_p1 }
   0x8   :  { %p144_p4 = pnand %p143_p3, %p137_p0 }
   0xa   :  { %147 = shalt.err (!%p144_p4)
}
   0xb   :  { %s188_s19 = smov [#allocation2]   ;;  %s148_s20 = scalar_lea.vmem %s28_s17, 16 }
   0xc   :  { %20 = dma.vmem_to_smem %s18_s14, 16, %s188_s19, [#allocation4]  }
   0xd   :  { %p149_p5 = scmp.ne.s32.totalorder %s28_s17, %s148_s20  ;;  %p153_p6 = scmp.lt.s32.totalorder %s28_s17, %s28_s17 }
   0xe   :  { %p154_p7 = scmp.lt.s32.totalorder %s148_s20, %s148_s20 }
  0x10   :  { %p155_p8 = por %p154_p7, %p153_p6 }
  0x12   :  { %p156_p9 = pnand %p155_p8, %p149_p5 }
  0x14   :  { %159 = shalt.err (!%p156_p9)
}
  0x15   :  { %s189_s0 = smov [#allocation5]  }
  0x16   :  { %30 = dma.vmem_to_smem %s28_s17, 16, %s189_s0, [#allocation6]  }
  0x17   :  { %182 = dma.done.wait [#allocation4], 16  }
  0x18   :  { %183 = vsyncadd [#allocation4], 4294967280 }
  0x19   :  { %184 = dma.done.wait [#allocation6], 16  }
  0x1a   :  { %185 = vsyncadd [#allocation6], 4294967280 }
  0x1b   :  { %39 = sfence }
  0x1c   :  { %s47_s1 = sld [smem:[#allocation2]]  ;;  %s119_s21 = sld [smem:[#allocation2 + $0x1]]  ;;  %v40_v0 = vld [vmem:[%s245_s2] sm:$0x1]  ;;  %v116_v1 = vld [vmem:[%s245_s2 + $0x1] sm:$0x1] }
  0x1d   :  { %s120_s22 = sld [smem:[#allocation2 + $0x2]]  ;;  %s121_s23 = sld [smem:[#allocation2 + $0x3]]  ;;  %v117_v2 = vld [vmem:[%s245_s2 + $0x2] sm:$0x1]  ;;  %v118_v3 = vld [vmem:[%s245_s2 + $0x3] sm:$0x1] }
  0x1e   :  { %s122_s24 = sld [smem:[#allocation2 + $0x4]]  ;;  %s123_s25 = sld [smem:[#allocation2 + $0x5]] }
  0x1f   :  { %s124_s26 = sld [smem:[#allocation2 + $0x6]]  ;;  %s125_s4 = sld [smem:[#allocation2 + $0x7]] }
  0x20   :  { %s62_s9 = sld [smem:[#allocation5]]  ;;  %s126_s10 = sld [smem:[#allocation5 + $0x1]] }
  0x21   :  { %s190_s2 = smov [#allocation7]  }
  0x22   :  { %v48_v4 = vstv %s47_s1  ;;  %v51_v5 = vstv %s119_s21  ;;  %s103_s11 = sshll.u32 %s190_s2, 4  ;;  %s104_s11 = int_to_ptr.vmem [resolvable:$true] %s103_s11 }
  0x23   :  { %v49_v6 = vmul.f32 %v48_v4, %v40_v0  ;;  %v52_v7 = vmul.f32 %v116_v1, %v51_v5  ;;  %v55_v8 = vstv %s120_s22  ;;  %v59_v9 = vstv %s121_s23  ;;  %s160_s12 = scalar_lea.vmem %s104_s11, 32  ;;  %p165_p11 = scmp.lt.s32.totalorder %s104_s11, %s104_s11 }
  0x24   :  { %v56_v10 = vmul.f32 %v117_v2, %v55_v8  ;;  %v60_v11 = vmul.f32 %v118_v3, %v59_v9  ;;  %v66_v12 = vstv %s122_s24  ;;  %v69_v15 = vstv %s123_s25  ;;  %p161_p10 = scmp.ne.s32.totalorder %s104_s11, %s160_s12  ;;  %p166_p12 = scmp.lt.s32.totalorder %s160_s12, %s160_s12 }
  0x25   :  { %v53_v13 = vadd.f32 %v52_v7, %v49_v6  ;;  %v67_v14 = vmul.f32 %v66_v12, %v40_v0  ;;  %v73_v16 = vstv %s124_s26  ;;  %v70_v17 = vmul.f32 %v116_v1, %v69_v15 }
  0x26   :  { %v74_v18 = vmul.f32 %v117_v2, %v73_v16  ;;  %v77_v19 = vstv %s125_s4  ;;  %v63_v24 = vstv %s62_s9  ;;  %v81_v26 = vstv %s126_s10  ;;  %p167_p13 = por %p166_p12, %p165_p11 }
  0x27   :  { %v57_v20 = vadd.f32 %v56_v10, %v53_v13  ;;  %v71_v21 = vadd.f32 %v70_v17, %v67_v14  ;;  %v78_v22 = vmul.f32 %v118_v3, %v77_v19 }
  0x28   :  { %p168_p0 = pnand %p167_p13, %p161_p10 }
  0x29   :  { %v61_v23 = vadd.f32 %v60_v11, %v57_v20  ;;  %v75_v25 = vadd.f32 %v74_v18, %v71_v21 }
  0x2b   :  { %v64_v27 = vadd.f32 %v63_v24, %v61_v23  ;;  %v79_v28 = vadd.f32 %v78_v22, %v75_v25 }
  0x2d   :  { %v82_v29 = vadd.f32 %v81_v26, %v79_v28 }
  0x2f   :  { %v83_v30 = vsub.f32 %v64_v27, %v82_v29  ;;  %vm92_vm0 = vcmp.ge.f32.partialorder %v64_v27, %v82_v29 }
  0x31   :  { %v84_v31 = vand.u32 2147483647, %v83_v30 }
  0x33   :  { %v85_v32 = vsub.f32 0.0, %v84_v31 }
  0x35   :  { %v86_v33 = vmul.f32 1.442695, %v85_v32 }
  0x37   :  { %132 = vpow2.f32 %v86_v33 }
  0x41   :  { %v133_v34 = vpop.eup %132 }
  0x42   :  { %v88_v35 = vadd.f32 1.0, %v133_v34 }
  0x44   :  { %134 = vrcp.f32 %v88_v35 }
  0x4e   :  { %v135_v36 = vpop.eup %134 }
  0x4f   :  { %v91_v37 = vmul.f32 %v135_v36, %v133_v34 }
  0x51   :  { %v93_v38 = vsel %vm92_vm0, %v135_v36, %v91_v37  ;;  %v95_v39 = vsel %vm92_vm0, %v91_v37, %v135_v36 }
  0x52   :  { %94 = vst [vmem:[#allocation7] sm:$0x1] %v93_v38  ;;  %97 = vst [vmem:[#allocation7 + $0x1] sm:$0x1] %v95_v39 }
  0x53   :  { %171 = shalt.err (!%p168_p0)
}
  0x54   :  { %s172_s15 = scalar_lea.hbm %s246_s3, 32 }
  0x55   :  { %p173_p1 = scmp.ne.s32.totalorder %s246_s3, %s172_s15  ;;  %p176_p2 = scmp.lt.u32.totalorder %s172_s15, %s246_s3 }
  0x57   :  { %p178_p3 = pnand %p176_p2, %p173_p1 }
  0x59   :  { %181 = shalt.err (!%p178_p3)
}
  0x5a   :  { %s191_s20 = smov 16   ;;  %s192_s0 = smov 1  }
  0x5b   :  { %109 = dma.vmem_to_hbm [thread:$0]  %s104_s11, 32, %s246_s3, [#allocation3], %s191_s20, %s191_s20, %s192_s0  }
  0x5c   :  { %186 = dma.done.wait [#allocation3], 32  }
  0x5d   :  { %187 = vsyncadd [#allocation3], 4294967264 }
  0x5e   :  { %113 = vsyncpa [#allocation3], 1 }
  0x5f   :  { %114 = vsyncpa [#allocation4], 1 }
  0x60   :  { %115 = vsyncpa [#allocation6], 1 }

</bundles_post_ra>
